<compile_context>
chip_gen: v7x
topology: tpu7x:2x2x1
jax: 0.10.0
libtpu: 0.0.40
codegen_flags: <defaults>
</compile_context>

<pallas_src>
import functools

import jax
import jax.numpy as jnp
from jax.experimental import pallas as pl
from jax.experimental.pallas import tpu as pltpu


# ---------------------------------------------------------------------------
# kernels
# ---------------------------------------------------------------------------
def _dense_kernel(relu, x_ref, w_ref, b_ref, o_ref):
    """o = (relu?)(x @ W + b), one row tile per grid step, full feature width."""
    acc = jnp.dot(x_ref[...].astype(jnp.bfloat16), w_ref[...],
                  preferred_element_type=jnp.float32) + b_ref[...]
    if relu:
        acc = jnp.maximum(acc, 0.0)
    o_ref[...] = acc.astype(o_ref.dtype)


def _gcn_layer_kernel(residual, a_ref, hk_ref, hi_ref, sw_ref, w_ref, b_ref,
                      o_ref, acc_ref):
    """One GCN layer: agg = A_ppi @ h (tiled over k), then update + residual."""
    k = pl.program_id(1)

    @pl.when(k == 0)
    def _():
        acc_ref[...] = jnp.zeros_like(acc_ref)

    # bf16 x bf16 -> f32 accumulation on the MXU.
    acc_ref[...] += jnp.dot(a_ref[...], hk_ref[...].astype(jnp.bfloat16),
                            preferred_element_type=jnp.float32)

    @pl.when(k == pl.num_programs(1) - 1)
    def _():
        upd = jnp.maximum(
            jnp.dot(acc_ref[...].astype(jnp.bfloat16), w_ref[...],
                    preferred_element_type=jnp.float32) + b_ref[...],
            0.0)
        if residual:
            # diagonal self-edge residual: elementwise, runs on the VPU.
            upd = upd + sw_ref[...] * hi_ref[...]
        o_ref[...] = upd.astype(o_ref.dtype)


# ---------------------------------------------------------------------------
# pallas_call wrappers
# ---------------------------------------------------------------------------
def _dense(x, w_bf16, b, *, tm, relu):
    n_p, f_in_p = x.shape
    f_out_p = w_bf16.shape[1]
    return pl.pallas_call(
        functools.partial(_dense_kernel, relu),
        out_shape=jax.ShapeDtypeStruct((n_p, f_out_p), jnp.float32),
        grid=(n_p // tm,),
        in_specs=[
            pl.BlockSpec((tm, f_in_p), lambda i: (i, 0)),
            pl.BlockSpec((f_in_p, f_out_p), lambda i: (0, 0)),
            pl.BlockSpec((1, f_out_p), lambda i: (0, 0)),
        ],
        out_specs=pl.BlockSpec((tm, f_out_p), lambda i: (i, 0)),
        compiler_params=pltpu.CompilerParams(
            dimension_semantics=("parallel",)),
    )(x, w_bf16, b)


def _gcn_layer(a_bf16, h, sw, w_bf16, b, *, residual, tm, tk):
    n_p, h_p = h.shape
    return pl.pallas_call(
        functools.partial(_gcn_layer_kernel, residual),
        out_shape=jax.ShapeDtypeStruct((n_p, h_p), jnp.float32),
        grid_spec=pltpu.PrefetchScalarGridSpec(
            num_scalar_prefetch=0,
            grid=(n_p // tm, n_p // tk),
            in_specs=[
                pl.BlockSpec((tm, tk), lambda i, k: (i, k)),    # A_ppi tile (bf16)
                pl.BlockSpec((tk, h_p), lambda i, k: (k, 0)),   # h rows for aggregation
                pl.BlockSpec((tm, h_p), lambda i, k: (i, 0)),   # h rows for residual
                pl.BlockSpec((tm, 1), lambda i, k: (i, 0)),     # self-edge weights
                pl.BlockSpec((h_p, h_p), lambda i, k: (0, 0)),  # W_g (bf16)
                pl.BlockSpec((1, h_p), lambda i, k: (0, 0)),    # b_g
            ],
            out_specs=pl.BlockSpec((tm, h_p), lambda i, k: (i, 0)),
            scratch_shapes=[pltpu.VMEM((tm, h_p), jnp.float32)],
        ),
        compiler_params=pltpu.CompilerParams(
            dimension_semantics=("parallel", "arbitrary")),
    )(a_bf16, h, h, sw, w_bf16, b)


# ---------------------------------------------------------------------------
# forward
# ---------------------------------------------------------------------------
def _round_up(v, m):
    return ((v + m - 1) // m) * m


def _pad2(a, rows, cols):
    return jnp.pad(a, ((0, rows - a.shape[0]), (0, cols - a.shape[1])))


def gcn_forward(x, a_ppi, self_w, w_in, b_in, w_g, b_g, w_out, b_out,
                *, num_gcn, residual=True, tm=128, tk=128):
    """GcnNet forward.  self_w: [N] per-node self-edge weights (diagonal a_self)."""
    n, f_in = x.shape
    hidden = w_in.shape[1]
    labels = w_out.shape[1]

    # lane-dense padding: 128-wide features/labels, node dim to tile multiple.
    n_p = _round_up(n, max(tm, tk))
    f_in_p = _round_up(f_in, 128)
    h_p = _round_up(hidden, 128)
    l_p = _round_up(labels, 128)

    x_p = _pad2(x, n_p, f_in_p)
    a_p = _pad2(a_ppi, n_p, n_p).astype(jnp.bfloat16)       # dominant stream -> bf16
    sw_p = _pad2(self_w.reshape(n, 1), n_p, 1)
    w_in_p = _pad2(w_in, f_in_p, h_p).astype(jnp.bfloat16)
    b_in_p = _pad2(b_in.reshape(1, -1), 1, h_p)
    w_g_p = [_pad2(w_g[i], h_p, h_p).astype(jnp.bfloat16) for i in range(num_gcn)]
    b_g_p = [_pad2(b_g[i].reshape(1, -1), 1, h_p) for i in range(num_gcn)]
    w_out_p = _pad2(w_out, h_p, l_p).astype(jnp.bfloat16)
    b_out_p = _pad2(b_out.reshape(1, -1), 1, l_p)

    # input projection + relu (dropout = identity in eval mode)
    h = _dense(x_p, w_in_p, b_in_p, tm=tm, relu=True)

    # GCN layers (each needs the full previous h, so one pipelined call per layer)
    for i in range(num_gcn):
        h = _gcn_layer(a_p, h, sw_p, w_g_p[i], b_g_p[i],
                       residual=residual, tm=tm, tk=tk)

    # output projection (lane-dense padded store, sliced back here)
    out_p = _dense(h, w_out_p, b_out_p, tm=tm, relu=False)
    return out_p[:n, :labels]


# ---------------------------------------------------------------------------
# reference + test
# ---------------------------------------------------------------------------
def _reference(x, a_ppi, self_w, w_in, b_in, w_g, b_g, w_out, b_out,
               *, num_gcn, residual=True):
    h = jnp.maximum(x @ w_in + b_in, 0.0)
    for i in range(num_gcn):
        agg = a_ppi @ h
        h_new = jnp.maximum(agg @ w_g[i] + b_g[i], 0.0)
        if residual:
            h_new = h_new + self_w[:, None] * h
        h = h_new
    return h @ w_out + b_out


def _xavier(key, shape):
    fan_in, fan_out = shape[-2], shape[-1]
    limit = (6.0 / (fan_in + fan_out)) ** 0.5
    return jax.random.uniform(key, shape, jnp.float32, -limit, limit)


if __name__ == "__main__":
    N = 256
    INPUT_SIZE = 32
    HIDDEN_SIZE = 32
    LABELS_NUM = 16
    NUM_GCN = 2
    RESIDUAL = True

    key = jax.random.PRNGKey(0)
    keys = jax.random.split(key, 10)

    x = jax.random.normal(keys[0], (N, INPUT_SIZE), jnp.float32)
    # weighted adjacency ('ppi' edge weights), row-normalized
    a_ppi = jax.random.uniform(keys[1], (N, N), jnp.float32)
    a_ppi = a_ppi / jnp.sum(a_ppi, axis=1, keepdims=True)
    # per-node self-edge weights (diagonal a_self)
    self_w = jax.random.uniform(keys[2], (N,), jnp.float32)

    w_in = _xavier(keys[3], (INPUT_SIZE, HIDDEN_SIZE))
    b_in = jax.random.normal(keys[4], (1, HIDDEN_SIZE), jnp.float32) * 0.01
    w_g = _xavier(keys[5], (NUM_GCN, HIDDEN_SIZE, HIDDEN_SIZE))
    b_g = jax.random.normal(keys[6], (NUM_GCN, 1, HIDDEN_SIZE), jnp.float32) * 0.01
    w_out = _xavier(keys[7], (HIDDEN_SIZE, LABELS_NUM))
    b_out = jax.random.normal(keys[8], (1, LABELS_NUM), jnp.float32) * 0.01

    out = gcn_forward(x, a_ppi, self_w, w_in, b_in, w_g, b_g, w_out, b_out,
                      num_gcn=NUM_GCN, residual=RESIDUAL)
    out = jax.block_until_ready(out)

    ref = _reference(x, a_ppi, self_w, w_in, b_in, w_g, b_g, w_out, b_out,
                     num_gcn=NUM_GCN, residual=RESIDUAL)

    assert out.shape == (N, LABELS_NUM)
    # tolerance loosened vs the f32 reference because adjacency/weights run in
    # bf16 on the MXU (f32 accumulation throughout).
    assert jnp.allclose(out, ref, atol=5e-2, rtol=5e-2), "mismatch vs reference"
    print("KERNEL_OK")
</pallas_src>

<mosaic_0001>
module attributes {stable_mosaic.version = 11 : i64} {
  func.func @_dense_kernel(%arg0: i32, %arg1: memref<128x128xf32, #tpu.memory_space<vmem>>, %arg2: memref<128x128xbf16, #tpu.memory_space<vmem>>, %arg3: memref<1x128xf32, #tpu.memory_space<vmem>>, %arg4: memref<128x128xf32, #tpu.memory_space<vmem>>) attributes {dimension_semantics = [#tpu.dimension_semantics<parallel>], iteration_bounds = array<i64: 2>, scalar_prefetch = 0 : i64, scratch_operands = 0 : i64, tpu.core_type = #tpu.core_type<tc>, window_params = [{transform_indices = @transform_0, window_bounds = array<i64: 128, 128>}, {pipeline_mode = #tpu.pipeline_mode<synchronous>, transform_indices = @transform_1, window_bounds = array<i64: 128, 128>}, {pipeline_mode = #tpu.pipeline_mode<synchronous>, transform_indices = @transform_2, window_bounds = array<i64: 1, 128>}, {transform_indices = @transform_3, window_bounds = array<i64: 128, 128>}]} {
    %c0 = arith.constant 0 : index
    %c0_0 = arith.constant 0 : index
    %0 = vector.load %arg1[%c0, %c0_0] : memref<128x128xf32, #tpu.memory_space<vmem>>, vector<128x128xf32>
    %1 = arith.truncf %0 : vector<128x128xf32> to vector<128x128xbf16>
    %c0_1 = arith.constant 0 : index
    %c0_2 = arith.constant 0 : index
    %2 = vector.load %arg2[%c0_1, %c0_2] : memref<128x128xbf16, #tpu.memory_space<vmem>>, vector<128x128xbf16>
    %cst = arith.constant dense<0.000000e+00> : vector<128x128xf32>
    %3 = tpu.matmul %1, %2, %cst {dimension_numbers = #tpu.dot_dimension_numbers<[1], [0], [0], [1], [0, 0, 1, 1], [], []>} : vector<128x128xbf16>, vector<128x128xbf16>, vector<128x128xf32> -> vector<128x128xf32>
    %c0_3 = arith.constant 0 : index
    %c0_4 = arith.constant 0 : index
    %4 = vector.load %arg3[%c0_3, %c0_4] : memref<1x128xf32, #tpu.memory_space<vmem>>, vector<1x128xf32>
    %5 = vector.broadcast %4 : vector<1x128xf32> to vector<128x128xf32>
    %6 = arith.addf %3, %5 : vector<128x128xf32>
    %cst_5 = arith.constant 0.000000e+00 : f32
    %7 = vector.broadcast %cst_5 : f32 to vector<128x128xf32>
    %8 = arith.maximumf %6, %7 : vector<128x128xf32>
    %c0_6 = arith.constant 0 : index
    %c0_7 = arith.constant 0 : index
    %9 = vector.load %arg4[%c0_6, %c0_7] : memref<128x128xf32, #tpu.memory_space<vmem>>, vector<128x128xf32>
    tpu.vector_store %arg4[%c0_6, %c0_7], %8 {strides = array<i32>} : memref<128x128xf32, #tpu.memory_space<vmem>>, vector<128x128xf32>,
    return
  }
  func.func @transform_0(%arg0: i32) -> (i32, i32) {
    %c0_i32 = arith.constant 0 : i32
    %c0_i32_0 = arith.constant 0 : i32
    return %arg0, %c0_i32 : i32, i32
  }
  func.func @transform_1(%arg0: i32) -> (i32, i32) {
    %c0_i32 = arith.constant 0 : i32
    %c0_i32_0 = arith.constant 0 : i32
    %c0_i32_1 = arith.constant 0 : i32
    return %c0_i32, %c0_i32_0 : i32, i32
  }
  func.func @transform_2(%arg0: i32) -> (i32, i32) {
    %c0_i32 = arith.constant 0 : i32
    %c0_i32_0 = arith.constant 0 : i32
    %c0_i32_1 = arith.constant 0 : i32
    return %c0_i32, %c0_i32_0 : i32, i32
  }
  func.func @transform_3(%arg0: i32) -> (i32, i32) {
    %c0_i32 = arith.constant 0 : i32
    %c0_i32_0 = arith.constant 0 : i32
    return %arg0, %c0_i32 : i32, i32
  }
}

</mosaic_0001>

<bundles_post_ra>
// kernel: tpu_custom_call.1
= control target key start
LH: loop header
LB: loop body
LE: loop exit
PB: predicated region body
PF: predicated region fallthrough
CT: control target
= control target key end

     0   :  { %8 = vsyncpa [#allocation3], 0  ;;  %s1094_s0 = inlined_call_operand.hbm [shape: f32[256,128], index: 0, kind: input, shape index: {}]   ;;  %s1095_s1 = inlined_call_operand.hbm [shape: bf16[128,128], index: 1, kind: input, shape index: {}]   ;;  %s1096_s2 = inlined_call_operand.vmem [shape: f32[1,128], index: 2, kind: input, shape index: {}]   ;;  %s1097_s3 = inlined_call_operand.hbm [shape: f32[256,128], index: 3, kind: output, shape index: {}]  }
   0x1   :  { %10 = vsyncpa [#allocation3 + $0x1], 0 }
   0x2   :  { %11 = vsyncpa [#allocation6], 0 }
   0x3   :  { %12 = vsyncpa [#allocation4], 0 }
   0x4   :  { %14 = vsyncpa [#allocation4 + $0x1], 0  ;;  %s849_s12 = smov 0   ;;  %s851_s13 = smov 0  }
   0x5   :  { %s853_s14 = smov 0   ;;  %s855_s15 = smov 0  }
   0x6 LB: > { %s870_s16 = sadd.s32 4294967295, %s818_s15   ;;  %s528_s17 = sadd.s32 4294967294, %s818_s15   ;;  %s818_s15 = sphi %s855_s15, %s1117_s15   ;;  %s814_s14 = sphi %s853_s14, %s1116_s14   ;;  %s810_s13 = sphi %s851_s13, %s1115_s13   ;;  %s806_s12 = sphi %s849_s12, %s1114_s12  }
   0x7   : > { %p40_p0 = scmp.ne.s32.totalorder %s810_s13, %s806_s12  ;;  %p1098_p1 = scmp.eq.s32.totalorder %s870_s16, 0 }
   0x8   : > { %p112_p3 = scmp.eq.s32.totalorder %s528_s17, 1  ;;  %p529_p5 = scmp.ge.s32.totalorder %s818_s15, 1 }
   0x9   : > { %p879_p4 = por %p1098_p1, %p40_p0  ;;  %p119_p7 = scmp.lt.s32.totalorder %s818_s15, 3 }
   0xa   : > { %p884_p6 = por %p112_p3, %p40_p0  ;;  %s820_s21 = smov [#allocation5]  }
   0xb   : > { %s1101_s18 = scalar_select %p879_p4, 1, 0 }
   0xc   : > { %s1102_s19 = scalar_select %p884_p6, 1, 0 }
   0xd   : > { %p889_p8 = pnand %p529_p5, %p119_p7  ;;  %s131_s22 = sshll.u32 %s820_s21, 4  ;;  %s893_s22 = int_to_ptr.vmem [resolvable:$true] %s131_s22 }
   0xe   : > { %s905_s24 = sadd.s32 1, %s818_s15   ;;  %s27_s25 = sadd.s32 1, %s814_s14 }
   0xf   : > { %s1103_s20 = scalar_select %p889_p8, 1, 0 }
  0x10   : > { %p627_p9 = pneg %p889_p8  ;;  %s24_s26 = ssub.s32 %s818_s15, %s905_s24 }
  0x11   : > { %s690_s29 = scalar_lea.hbm %s1095_s1, 1024 }
  0x12   : > { %p900_p11 = pnand %p627_p9, %p1098_p1  ;;  %p691_p12 = scmp.ne.s32.totalorder %s1095_s1, %s690_s29 }
  0x13   : > { %p697_p5 = scmp.lt.u32.totalorder %s690_s29, %s1095_s1 }
  0x14   : > { %p692_p13 = pneg %p900_p11 }
  0x16   : > { %p693_p0 = pnand %p692_p13, %p691_p12 }
  0x18   : > { %p694_p3 = pneg %p693_p0 }
  0x1a   : > { %p699_p7 = pnand %p697_p5, %p694_p3 }
  0x1c   : > { %702 = shalt.err (!%p699_p7)
}
  0x1d   : > { %s703_s7 = scalar_lea.vmem %s893_s22, 1024  ;;  %p711_p2 = scmp.lt.s32.totalorder %s893_s22, %s893_s22 }
  0x1e   : > { %p704_p9 = scmp.ne.s32.totalorder %s893_s22, %s703_s7  ;;  %p712_p6 = scmp.lt.s32.totalorder %s703_s7, %s703_s7 }
  0x20   : > { %p706_p10 = pnand %p704_p9, %p692_p13  ;;  %p713_p4 = por %p712_p6, %p711_p2 }
  0x22   : > { %p707_p1 = pneg %p706_p10 }
  0x24   : > { %p714_p8 = pnand %p713_p4, %p707_p1 }
  0x26   : > { %717 = shalt.err (!%p714_p8)
}
  0x27   : > { %s821_s8 = smov 64   ;;  %s822_s9 = smov 4  }
  0x28   : > { %630 = dma.hbm_to_vmem [thread:$0]  (!%p900_p11), %s1095_s1, 1024, %s893_s22, [#allocation6], %s821_s8, %s821_s8, %s822_s9  }
  0x29   : > { %p25_p2 = scmp.eq.s32.totalorder %s24_s26, 0  ;;  %p34_p1 = scmp.ne.s32.totalorder %s814_s14, %s810_s13 }
  0x2a   : > { %p35_p4 = scmp.eq.s32.totalorder %s818_s15, 0  ;;  %p640_p6 = scmp.lt.s32.totalorder %s818_s15, 2 }
  0x2b   : > { %s936_s17 = scalar_select %p25_p2, %s814_s14, %s27_s25  }
  0x2c   : > { %p36_p8 = por %p35_p4, %p34_p1  ;;  %p1105_p10 = scmp.eq.s32.totalorder %s870_s16, 1 }
  0x2d   : > { %s148_s27 = sand.u32 1, %s814_s14   ;;  %s553_s28 = sshll.u32 %s818_s15, 11 }
  0x2e   : > { %p940_p12 = por %p1105_p10, %p34_p1  ;;  %s532_s29 = sshll.u32 %s148_s27, 7 }
  0x2f   : > { %s949_s4 = scalar_lea.hbm %s1094_s0, %s553_s28  ;;  %s152_s22 = scalar_lea.vmem [#allocation2], %s532_s29 }
  0x30   : > { %s159_s25 = sshll.u32 %s152_s22, 4  ;;  %p951_p11 = pnand %p640_p6, %p36_p8  ;;  %s955_s25 = int_to_ptr.vmem [resolvable:$true] %s159_s25 }
  0x31   : > { %s957_s5 = scalar_lea.sflag [#allocation3], %s148_s27  ;;  %s718_s6 = scalar_lea.hbm %s949_s4, 2048 }
  0x32   : > { %p719_p13 = scmp.ne.s32.totalorder %s949_s4, %s718_s6  ;;  %p720_p0 = pneg %p951_p11 }
  0x33   : > { %s723_s9 = scalar_lea.hbm %s1094_s0, 4096  ;;  %p724_p7 = scmp.lt.u32.totalorder %s949_s4, %s1094_s0 }
  0x34   : > { %p721_p3 = pnand %p720_p0, %p719_p13  ;;  %p725_p9 = scmp.lt.u32.totalorder %s723_s9, %s718_s6 }
  0x35   : > { %p727_p1 = scmp.lt.u32.totalorder %s718_s6, %s949_s4 }
  0x36   : > { %p722_p5 = pneg %p721_p3  ;;  %p726_p2 = por %p725_p9, %p724_p7 }
  0x38   : > { %p728_p4 = por %p727_p1, %p726_p2 }
  0x3a   : > { %p729_p6 = pnand %p728_p4, %p722_p5 }
  0x3c   : > { %732 = shalt.err (!%p729_p6)
}
  0x3d   : > { %s733_s27 = scalar_lea.vmem %s955_s25, 2048  ;;  %s823_s28 = smov [#allocation2]  }
  0x3e   : > { %p734_p8 = scmp.ne.s32.totalorder %s955_s25, %s733_s27  ;;  %s738_s29 = sshll.u32 %s823_s28, 4  ;;  %s739_s29 = int_to_ptr.vmem [resolvable:$false] %s738_s29 }
  0x3f   : > { %s740_s23 = scalar_lea.vmem %s739_s29, 4096  ;;  %p741_p3 = scmp.lt.s32.totalorder %s955_s25, %s739_s29 }
  0x40   : > { %p736_p10 = pnand %p734_p8, %p720_p0  ;;  %p742_p7 = scmp.lt.s32.totalorder %s740_s23, %s733_s27 }
  0x42   : > { %p737_p13 = pneg %p736_p10  ;;  %p743_p9 = por %p742_p7, %p741_p3 }
  0x44   : > { %p744_p2 = pnand %p743_p9, %p737_p13 }
  0x46   : > { %747 = shalt.err (!%p744_p2)
}
  0x47   : > { %s824_s30 = smov 128   ;;  %s825_s22 = smov 8  }
  0x48   : > { %634 = dma.hbm_to_vmem [thread:$0]  (!%p951_p11), %s949_s4, 2048, %s955_s25, %s957_s5, %s824_s30, %s824_s30, %s825_s22  }
  0x49   : > { %p1108_p0 = scmp.ne.s32.totalorder %s1103_s20, 0 }
  0x4a   : > { %s988_s6 = sand.u32 (!%p1108_p0), 1, %s810_s13   ;;  %p1109_p5 = scmp.ne.s32.totalorder (!%p1108_p0), %s1101_s18, 0 }
  0x4b   : > { %171 = sbr.rel (%p1108_p0) target bundleno = 361 (0x169), region = 32  ;;  %s536_s7 = sshll.u32 (!%p1108_p0), %s988_s6, 7 }
  0x4c   : > { %s174_s8 = scalar_lea.sflag (!%p1108_p0), [#allocation3], %s988_s6  ;;  %s994_s9 = scalar_lea.vmem (!%p1108_p0), [#allocation2], %s536_s7 }
  0x52   : > { %793 = dma.done.wait (%p1109_p5), %s174_s8, 2048  }
  0x53   : > { %795 = vsyncadd (%p1109_p5), %s174_s8, 4294965248  ;;  %p1110_p11 = scmp.eq.s32.totalorder %s870_s16, 0 }
  0x55   : > { %797 = dma.done.wait (%p1110_p11), [#allocation6], 1024   ;;  %p1111_p1 = pmov %p1110_p11 }
  0x56   : > { %v682_v0 = vld [vmem:[#allocation5] sm:$0xff]   ;;  %v683_v1 = vld [vmem:[#allocation5 + $0x8] sm:$0xff]   ;;  %v684_v2 = vld [vmem:[#allocation5 + $0x10] sm:$0xff]   ;;  %s1025_s4 = scalar_lea.vmem [#allocation7], %s536_s7  ;;  %s554_s25 = sshll.u32 %s870_s16, 11 }
  0x57   : > { %799 = vsyncadd (%p1111_p1), [#allocation6], 4294966272  ;;  %571 = vmatprep.subr.bf16.mxu0 %v682_v0  ;;  %603 = vmatprep.subr.bf16.mxu1 %v682_v0  ;;  %v685_v3 = vld [vmem:[#allocation5 + $0x18] sm:$0xff]   ;;  %v207_v4 = vld [vmem:[%s994_s9] sm:$0xff]  ;;  %s445_s26 = sshll.u32 %s1025_s4, 4  ;;  %s1042_s10 = scalar_lea.hbm %s1097_s3, %s554_s25  ;;  %s1044_s26 = int_to_ptr.vmem [resolvable:$true] %s445_s26 }
  0x58   : > { %572 = vmatpush3.bf16.msra.mxu0 %v682_v0  ;;  %611 = vmatpush3.bf16.msra.mxu1 %v682_v0  ;;  %v208_v5 = vld [vmem:[%s994_s9 + $0x8] sm:$0xff]  ;;  %v215_v6 = vld [vmem:[%s994_s9 + $0x40] sm:$0xff]  ;;  %v688_v12 = vld [vmem:[#allocation5 + $0x30] sm:$0xff]   ;;  %s432_s11 = scalar_lea.sflag [#allocation4], %s988_s6  ;;  %s748_s27 = scalar_lea.vmem %s1044_s26, 2048 }
  0x59   : > { %573 = vmatprep.subr.bf16.mxu0 %v683_v1  ;;  %604 = vmatprep.subr.bf16.mxu1 %v683_v1  ;;  %v223_v7 = vpack.c.bf16 %v208_v5, %v207_v4  ;;  %v216_v8 = vld [vmem:[%s994_s9 + $0x48] sm:$0xff]  ;;  %v686_v10 = vld [vmem:[#allocation5 + $0x20] sm:$0xff]   ;;  %v689_v13 = vld [vmem:[#allocation5 + $0x38] sm:$0xff]   ;;  %p749_p4 = scmp.ne.s32.totalorder %s1044_s26, %s748_s27  ;;  %s826_s28 = smov [#allocation7]  }
  0x5a   : > { %v227_v9 = vpack.c.bf16 %v216_v8, %v215_v6  ;;  %v687_v11 = vld [vmem:[#allocation5 + $0x28] sm:$0xff]   ;;  %v209_v14 = vld [vmem:[%s994_s9 + $0x10] sm:$0xff]  ;;  %v210_v15 = vld [vmem:[%s994_s9 + $0x18] sm:$0xff]  ;;  %s752_s29 = sshll.u32 %s826_s28, 4  ;;  %s753_s29 = int_to_ptr.vmem [resolvable:$false] %s752_s29 }
  0x5b   : > { %587 = vmatprep.mubr.bf16.mxu0 %v223_v7  ;;  %v217_v16 = vld [vmem:[%s994_s9 + $0x50] sm:$0xff]  ;;  %v218_v17 = vld [vmem:[%s994_s9 + $0x58] sm:$0xff]  ;;  %v211_v18 = vld [vmem:[%s994_s9 + $0x20] sm:$0xff]  ;;  %v224_v22 = vpack.c.bf16 %v210_v15, %v209_v14  ;;  %p750_p6 = pnand %p749_p4, %p940_p12  ;;  %s754_s23 = scalar_lea.vmem %s753_s29, 4096 }
  0x5c   : > { %574 = vmatpush3.bf16.msra.mxu0 %v683_v1  ;;  %612 = vmatpush3.bf16.msra.mxu1 %v683_v1  ;;  %v212_v19 = vld [vmem:[%s994_s9 + $0x28] sm:$0xff]  ;;  %v219_v20 = vld [vmem:[%s994_s9 + $0x60] sm:$0xff]  ;;  %v228_v23 = vpack.c.bf16 %v218_v17, %v217_v16  ;;  %v213_v26 = vld [vmem:[%s994_s9 + $0x30] sm:$0xff]  ;;  %p755_p10 = scmp.lt.s32.totalorder %s1044_s26, %s753_s29  ;;  %p756_p13 = scmp.lt.s32.totalorder %s754_s23, %s748_s27 }
  0x5d   : > { %575 = vmatprep.subr.bf16.mxu0 %v684_v2  ;;  %605 = vmatprep.subr.bf16.mxu1 %v684_v2  ;;  %v220_v21 = vld [vmem:[%s994_s9 + $0x68] sm:$0xff]  ;;  %v225_v24 = vpack.c.bf16 %v212_v19, %v211_v18  ;;  %v214_v27 = vld [vmem:[%s994_s9 + $0x38] sm:$0xff]  ;;  %v221_v28 = vld [vmem:[%s994_s9 + $0x70] sm:$0xff]  ;;  %p751_p8 = pneg %p750_p6 }
  0x5e   : > { %595 = vmatprep.mubr.bf16.mxu1 %v227_v9  ;;  %v229_v25 = vpack.c.bf16 %v220_v21, %v219_v20  ;;  %v222_v29 = vld [vmem:[%s994_s9 + $0x78] sm:$0xff]  ;;  %v226_v30 = vpack.c.bf16 %v214_v27, %v213_v26  ;;  %v539_v32 = vld [vmem:[%s1096_s2] ss:$0 sm:$0xff]  ;;  %p757_p3 = por %p756_p13, %p755_p10 }
  0x5f   : > { %v230_v31 = vpack.c.bf16 %v222_v29, %v221_v28 }
  0x60   : > { %576 = vmatpush3.bf16.msra.mxu0 %v684_v2  ;;  %613 = vmatpush3.bf16.msra.mxu1 %v684_v2  ;;  %p758_p7 = pnand %p757_p3, %p751_p8 }
  0x61   : > { %577 = vmatprep.subr.bf16.mxu0 %v685_v3  ;;  %606 = vmatprep.subr.bf16.mxu1 %v685_v3 }
  0x64   : > { %578 = vmatpush3.bf16.msra.mxu0 %v685_v3  ;;  %614 = vmatpush3.bf16.msra.mxu1 %v685_v3 }
  0x65   : > { %579 = vmatprep.subr.bf16.mxu0 %v686_v10  ;;  %607 = vmatprep.subr.bf16.mxu1 %v686_v10 }
  0x68   : > { %580 = vmatpush3.bf16.msra.mxu0 %v686_v10  ;;  %615 = vmatpush3.bf16.msra.mxu1 %v686_v10 }
  0x69   : > { %581 = vmatprep.subr.bf16.mxu0 %v687_v11  ;;  %608 = vmatprep.subr.bf16.mxu1 %v687_v11 }
  0x6c   : > { %582 = vmatpush3.bf16.msra.mxu0 %v687_v11  ;;  %616 = vmatpush3.bf16.msra.mxu1 %v687_v11 }
  0x6d   : > { %583 = vmatprep.subr.bf16.mxu0 %v688_v12  ;;  %609 = vmatprep.subr.bf16.mxu1 %v688_v12 }
  0x70   : > { %584 = vmatpush3.bf16.msra.mxu0 %v688_v12  ;;  %617 = vmatpush3.bf16.msra.mxu1 %v688_v12 }
  0x71   : > { %585 = vmatprep.subr.bf16.mxu0 %v689_v13  ;;  %610 = vmatprep.subr.bf16.mxu1 %v689_v13 }
  0x74   : > { %586 = vmatpush3.bf16.msra.mxu0 %v689_v13  ;;  %618 = vmatpush3.bf16.msra.mxu1 %v689_v13 }
  0x77   : > { %588 = vmatmul.mubr.bf16.vlgmr.msra.gmra.mrb[0].mxu0 %v224_v22  ;;  %596 = vmatmul.mubr.bf16.vlgmr.msra.gmra.mrb[0].mxu1 %v228_v23 }
  0x78   : > { %591 = vmatprep.mubr.bf16.mxu0 %v225_v24  ;;  %599 = vmatprep.mubr.bf16.mxu1 %v229_v25 }
  0x7f   : > { %592 = vmatmul.mubr.bf16.gmra.mrb[4].mxu0 %v226_v30  ;;  %600 = vmatmul.mubr.bf16.gmra.mrb[4].mxu1 %v230_v31 }
 0x14a   : > { %v589_v33 = vpop.f32.mrb[0].mxu0  ;;  %v597_v34 = vpop.f32.mrb[0].mxu1 }
 0x14b   : > { %v345_v35 = vadd.f32 %v589_v33, %v539_v32  ;;  %v377_v36 = vadd.f32 %v597_v34, %v539_v32  ;;  %v336_v37 = vpop.f32.mrb[1].mxu0  ;;  %v368_v38 = vpop.f32.mrb[1].mxu1 }
 0x14c   : > { %v337_v39 = vadd.f32 %v539_v32, %v336_v37  ;;  %v369_v40 = vadd.f32 %v539_v32, %v368_v38  ;;  %v590_v41 = vpop.f32.mrb[2].mxu0  ;;  %v598_v42 = vpop.f32.mrb[2].mxu1 }
 0x14d   : > { %v401_v43 = vmax.f32 %v345_v35, 0.0  ;;  %v409_v44 = vmax.f32 %v377_v36, 0.0  ;;  %v348_v45 = vadd.f32 %v590_v41, %v539_v32  ;;  %v380_v46 = vadd.f32 %v598_v42, %v539_v32  ;;  %v339_v47 = vpop.f32.mrb[3].mxu0  ;;  %v371_v48 = vpop.f32.mrb[3].mxu1 }
 0x14e   : > { %v399_v49 = vmax.f32 %v337_v39, 0.0  ;;  %v407_v50 = vmax.f32 %v369_v40, 0.0  ;;  %v340_v51 = vadd.f32 %v539_v32, %v339_v47  ;;  %v372_v52 = vadd.f32 %v539_v32, %v371_v48 }
 0x14f   : > { %417 = vst [vmem:[%s1025_s4 + $0x10] sm:$0xff] %v401_v43  ;;  %425 = vst [vmem:[%s1025_s4 + $0x50] sm:$0xff] %v409_v44  ;;  %v402_v53 = vmax.f32 %v348_v45, 0.0  ;;  %v410_v54 = vmax.f32 %v380_v46, 0.0 }
 0x150   : > { %415 = vst [vmem:[%s1025_s4] sm:$0xff] %v399_v49  ;;  %423 = vst [vmem:[%s1025_s4 + $0x40] sm:$0xff] %v407_v50  ;;  %v400_v55 = vmax.f32 %v340_v51, 0.0  ;;  %v408_v56 = vmax.f32 %v372_v52, 0.0 }
 0x151   : > { %418 = vst [vmem:[%s1025_s4 + $0x18] sm:$0xff] %v402_v53  ;;  %426 = vst [vmem:[%s1025_s4 + $0x58] sm:$0xff] %v410_v54 }
 0x152   : > { %416 = vst [vmem:[%s1025_s4 + $0x8] sm:$0xff] %v400_v55  ;;  %424 = vst [vmem:[%s1025_s4 + $0x48] sm:$0xff] %v408_v56  ;;  %v593_v57 = vpop.f32.mrb[4].mxu0  ;;  %v601_v58 = vpop.f32.mrb[4].mxu1 }
 0x153   : > { %v361_v59 = vadd.f32 %v593_v57, %v539_v32  ;;  %v393_v60 = vadd.f32 %v601_v58, %v539_v32  ;;  %v352_v61 = vpop.f32.mrb[5].mxu0  ;;  %v384_v62 = vpop.f32.mrb[5].mxu1 }
 0x154   : > { %v353_v63 = vadd.f32 %v539_v32, %v352_v61  ;;  %v385_v0 = vadd.f32 %v539_v32, %v384_v62  ;;  %v594_v1 = vpop.f32.mrb[6].mxu0  ;;  %v602_v2 = vpop.f32.mrb[6].mxu1 }
 0x155   : > { %v405_v3 = vmax.f32 %v361_v59, 0.0  ;;  %v413_v4 = vmax.f32 %v393_v60, 0.0  ;;  %v364_v5 = vadd.f32 %v594_v1, %v539_v32  ;;  %v396_v6 = vadd.f32 %v602_v2, %v539_v32  ;;  %v355_v7 = vpop.f32.mrb[7].mxu0  ;;  %v387_v8 = vpop.f32.mrb[7].mxu1 }
 0x156   : > { %v403_v9 = vmax.f32 %v353_v63, 0.0  ;;  %v411_v10 = vmax.f32 %v385_v0, 0.0  ;;  %v356_v11 = vadd.f32 %v539_v32, %v355_v7  ;;  %v388_v12 = vadd.f32 %v539_v32, %v387_v8 }
 0x157   : > { %421 = vst [vmem:[%s1025_s4 + $0x30] sm:$0xff] %v405_v3  ;;  %429 = vst [vmem:[%s1025_s4 + $0x70] sm:$0xff] %v413_v4  ;;  %v406_v13 = vmax.f32 %v364_v5, 0.0  ;;  %v414_v14 = vmax.f32 %v396_v6, 0.0 }
 0x158   : > { %419 = vst [vmem:[%s1025_s4 + $0x20] sm:$0xff] %v403_v9  ;;  %427 = vst [vmem:[%s1025_s4 + $0x60] sm:$0xff] %v411_v10  ;;  %v404_v15 = vmax.f32 %v356_v11, 0.0  ;;  %v412_v16 = vmax.f32 %v388_v12, 0.0 }
 0x159   : > { %422 = vst [vmem:[%s1025_s4 + $0x38] sm:$0xff] %v406_v13  ;;  %430 = vst [vmem:[%s1025_s4 + $0x78] sm:$0xff] %v414_v14 }
 0x15a   : > { %420 = vst [vmem:[%s1025_s4 + $0x28] sm:$0xff] %v404_v15  ;;  %428 = vst [vmem:[%s1025_s4 + $0x68] sm:$0xff] %v412_v16 }
 0x15b   : > { %761 = shalt.err (!%p758_p7)
}
 0x15c   : > { %s762_s30 = scalar_lea.hbm %s1042_s10, 2048  ;;  %s766_s8 = scalar_lea.hbm %s1097_s3, 4096 }
 0x15d   : > { %p763_p9 = scmp.ne.s32.totalorder %s1042_s10, %s762_s30  ;;  %p767_p5 = scmp.lt.u32.totalorder %s1042_s10, %s1097_s3 }
 0x15e   : > { %p768_p11 = scmp.lt.u32.totalorder %s766_s8, %s762_s30  ;;  %p770_p4 = scmp.lt.u32.totalorder %s762_s30, %s1042_s10 }
 0x15f   : > { %p764_p2 = pnand %p763_p9, %p940_p12 }
 0x160   : > { %p769_p1 = por %p768_p11, %p767_p5 }
 0x161   : > { %p765_p0 = pneg %p764_p2 }
 0x162   : > { %p771_p6 = por %p770_p4, %p769_p1 }
 0x164   : > { %p772_p8 = pnand %p771_p6, %p765_p0 }
 0x166   : > { %775 = shalt.err (!%p772_p8)
}
 0x167   : > { %s827_s20 = smov 128   ;;  %s828_s4 = smov 8  }
 0x168   : > { %625 = dma.vmem_to_hbm [thread:$0]  (%p940_p12), %s1044_s26, 2048, %s1042_s10, %s432_s11, %s827_s20, %s827_s20, %s828_s4  }
 0x169 PF: > { %s460_s25 = sand.u32 1, %s806_s12   ;;  %p1112_p10 = scmp.ne.s32.totalorder %s1102_s19, 0 }
 0x16a   : > { %p1113_p13 = scmp.ge.s32.totalorder %s818_s15, 2  ;;  %s461_s16 = scalar_lea.sflag [#allocation4], %s460_s25 }
 0x16c   : > { %p636_p3 = pnand %p1113_p13, %p1112_p10 }
 0x16e   : > { %801 = dma.done.wait (!%p636_p3), %s461_s16, 2048  }
 0x16f   : > { %803 = vsyncadd (!%p636_p3), %s461_s16, 4294965248  ;;  %p17_p7 = scmp.ge.s32.totalorder %s905_s24, 4   ;;  %s1114_s12 = smov %s810_s13 }
 0x170   : > { %s1115_s13 = smov %s814_s14  ;;  %s1116_s14 = smov %s936_s17 }
 0x171   : > { %s1117_s15 = smov %s905_s24  ;;  %19 = sbr.rel (!%p17_p7) target bundleno = 6 (0x6), region = 81 }
 0x178   :  { %466 = vsyncpa [#allocation3], 1 }
 0x179   :  { %468 = vsyncpa [#allocation3 + $0x1], 1 }
 0x17a   :  { %469 = vsyncpa [#allocation6], 1 }
 0x17b   :  { %470 = vsyncpa [#allocation4], 1 }
 0x17c   :  { %472 = vsyncpa [#allocation4 + $0x1], 1 }

</bundles_post_ra>
